<compile_context>
chip_gen: v7x
topology: tpu7x:2x2x1
jax: 0.10.0
libtpu: 0.0.40
codegen_flags: <defaults>
</compile_context>

<pallas_src>
import functools

import jax
import jax.numpy as jnp
from jax.experimental import pallas as pl
from jax.experimental.pallas import tpu as pltpu

ACTION_CONTINUOUS = 1
ACTION_DISCRETE = 0

_LANES = 128
_SUBLANES = 8
_NEG_BIG = -1e30   # "minus infinity" for padded logit lanes (exp underflows to 0)
_MAX_TILE = 4096   # per-review cap: safe under v5e's 16 MiB default scoped VMEM


def _round_up(n, m):
    return (n + m - 1) // m * m


def _pick_batch_tile(B, requested):
    """Batch tile: big enough to amortize grid-step overhead, small enough for
    every generation's default scoped VMEM, and >=2 grid steps for large B so
    v7x's two TensorCores both get work."""
    if B <= _SUBLANES:
        return B                                   # single full-extent block
    if requested is not None:
        tb = max(_SUBLANES, min(requested, B))
        return (tb // _SUBLANES) * _SUBLANES
    full8 = (B // _SUBLANES) * _SUBLANES
    if full8 <= 1024:
        return full8                               # whole batch in one tile
    half = _round_up(pl.cdiv(B, 2), _SUBLANES)     # >=2 steps for megacore
    return max(_SUBLANES, min(_MAX_TILE, half, full8))


# ---------------------------------------------------------------------------
# Kernels
# ---------------------------------------------------------------------------
def _mlp_trunk(x_ref, w1_ref, b1_ref, w2_ref, b2_ref):
    """x -> tanh(linear) -> tanh(linear2).  MXU in the input dtype (f32 or
    bf16), accumulation + element-wise math always f32."""
    h = jnp.dot(x_ref[...], w1_ref[...], preferred_element_type=jnp.float32)
    h = jnp.tanh(h + b1_ref[...])
    h = jnp.dot(h.astype(w2_ref.dtype), w2_ref[...],
                preferred_element_type=jnp.float32)
    return jnp.tanh(h + b2_ref[...])


def _actor_discrete_kernel(x_ref, w1_ref, b1_ref, w2_ref, b2_ref,
                           wh_ref, bh_ref, out_ref):
    h = _mlp_trunk(x_ref, w1_ref, b1_ref, w2_ref, b2_ref)
    # Padded lanes carry a -1e30 bias so their exp() underflows to 0: the
    # softmax over the padded slab equals the softmax over the real actions.
    logits = jnp.dot(h.astype(wh_ref.dtype), wh_ref[...],
                     preferred_element_type=jnp.float32) + bh_ref[...]
    # torch's global-max subtraction is subsumed by the row-max subtraction
    # (identical output), so it is dropped — saves an XLU reduction.
    z = logits - jnp.max(logits, axis=-1, keepdims=True)
    e = jnp.exp(z)
    # Exact divide (NOT approx reciprocal): downstream numpy.random.choice
    # requires the probabilities to sum to 1 at f32 precision.
    probs = e / jnp.sum(e, axis=-1, keepdims=True)
    out_ref[...] = probs.astype(out_ref.dtype)


def _actor_continuous_kernel(x_ref, w1_ref, b1_ref, w2_ref, b2_ref,
                             wh_ref, bh_ref, out_ref, *, distribution):
    h = _mlp_trunk(x_ref, w1_ref, b1_ref, w2_ref, b2_ref)
    # Fused heads: wh = [w_param1 | w_param2] padded to round_up(2A, 8) lanes.
    y = jnp.dot(h.astype(wh_ref.dtype), wh_ref[...],
                preferred_element_type=jnp.float32) + bh_ref[...]
    if distribution == "normal":
        y = jax.nn.sigmoid(y)
    elif distribution == "beta":
        y = jax.nn.softplus(y)
    else:
        raise ValueError("unknown distribution")
    out_ref[...] = y.astype(out_ref.dtype)


# ---------------------------------------------------------------------------
# Wrapper
# ---------------------------------------------------------------------------
def actor_forward(params, x, *, action_type, distribution=None,
                  batch_tile=None, compute_dtype=None, out_dtype=jnp.float32):
    """Actor forward pass with Pallas kernels.

    params: dict with pre-transposed weights ([in, out]) and biases ([1, out]).
    x: [B, num_features].
    compute_dtype: e.g. jnp.bfloat16 on v6e/v7x (halves x DMA, native MXU);
                   accumulation / element-wise math stays f32 either way.
    out_dtype:     e.g. jnp.bfloat16 to halve the output writeback.
    """
    B, F = x.shape
    H = params["w1"].shape[1]
    A = params["w_head_a"].shape[1]
    cdt = compute_dtype if compute_dtype is not None else x.dtype

    xk = x.astype(cdt)
    w1 = params["w1"].astype(cdt)
    w2 = params["w2"].astype(cdt)
    b1 = params["b1"].astype(jnp.float32)
    b2 = params["b2"].astype(jnp.float32)

    # --- pack the head(s); pad only to a sublane multiple (not 128 lanes) so
    #     the dominant HBM writeback stays ~A-wide instead of 128-wide. -------
    if action_type == ACTION_DISCRETE:
        out_cols = _round_up(max(A, 1), _SUBLANES)
        wh = jnp.pad(params["w_head_a"], ((0, 0), (0, out_cols - A))).astype(cdt)
        bh = jnp.pad(params["b_head_a"], ((0, 0), (0, out_cols - A)),
                     constant_values=_NEG_BIG).astype(jnp.float32)
        kern = _actor_discrete_kernel
    else:
        out_cols = _round_up(2 * A, _SUBLANES)
        wh = jnp.concatenate([params["w_head_a"], params["w_head_b"]], axis=1)
        bh = jnp.concatenate([params["b_head_a"], params["b_head_b"]], axis=1)
        wh = jnp.pad(wh, ((0, 0), (0, out_cols - 2 * A))).astype(cdt)
        bh = jnp.pad(bh, ((0, 0), (0, out_cols - 2 * A))).astype(jnp.float32)
        kern = functools.partial(_actor_continuous_kernel,
                                 distribution=distribution)

    # --- batch tiling: no input pad, no output row-slice; ragged last tiles
    #     use Pallas' partial-block masked load/store. -------------------------
    tb = _pick_batch_tile(B, batch_tile)
    grid = (pl.cdiv(B, tb),)
    resident = lambda i: (0, 0)   # weights/biases stay in VMEM across the grid

    out = pl.pallas_call(
        kern,
        out_shape=jax.ShapeDtypeStruct((B, out_cols), out_dtype),
        grid=grid,
        in_specs=[
            pl.BlockSpec((tb, F), lambda i: (i, 0)),     # x tile (pipelined)
            pl.BlockSpec((F, H), resident),              # w1
            pl.BlockSpec((1, H), resident),              # b1 (f32)
            pl.BlockSpec((H, H), resident),              # w2
            pl.BlockSpec((1, H), resident),              # b2 (f32)
            pl.BlockSpec((H, out_cols), resident),       # fused/padded head W
            pl.BlockSpec((1, out_cols), resident),       # fused/padded head b (f32)
        ],
        out_specs=pl.BlockSpec((tb, out_cols), lambda i: (i, 0)),
        compiler_params=pltpu.CompilerParams(
            dimension_semantics=("parallel",)),
    )(xk, w1, b1, w2, b2, wh, bh)

    if action_type == ACTION_DISCRETE:
        return out[:, :A]
    return out[:, :A], out[:, A:2 * A]


# ---------------------------------------------------------------------------
# Deterministic parameter init (mirrors torch.nn.Linear shapes, transposed)
# ---------------------------------------------------------------------------
def init_actor_params(key, num_features, num_actions, hidden=32):
    ks = jax.random.split(key, 8)

    def linear(kw, kb, fan_in, fan_out):
        bound = 1.0 / jnp.sqrt(float(fan_in))
        w = jax.random.uniform(kw, (fan_in, fan_out), jnp.float32, -bound, bound)
        b = jax.random.uniform(kb, (1, fan_out), jnp.float32, -bound, bound)
        return w, b

    w1, b1 = linear(ks[0], ks[1], num_features, hidden)
    w2, b2 = linear(ks[2], ks[3], hidden, hidden)
    wa, ba = linear(ks[4], ks[5], hidden, num_actions)   # linear3 / linear_param1
    wb, bb = linear(ks[6], ks[7], hidden, num_actions)   # linear_param2
    return {"w1": w1, "b1": b1, "w2": w2, "b2": b2,
            "w_head_a": wa, "b_head_a": ba,
            "w_head_b": wb, "b_head_b": bb}


# ---------------------------------------------------------------------------
# Pure-JAX reference for sanity checks
# ---------------------------------------------------------------------------
def actor_forward_ref(params, x, *, action_type, distribution=None):
    h = jnp.tanh(x @ params["w1"] + params["b1"])
    h = jnp.tanh(h @ params["w2"] + params["b2"])
    if action_type == ACTION_DISCRETE:
        logits = h @ params["w_head_a"] + params["b_head_a"]
        logits = logits - jnp.max(logits)
        return jax.nn.softmax(logits, axis=-1)
    x1 = h @ params["w_head_a"] + params["b_head_a"]
    x2 = h @ params["w_head_b"] + params["b_head_b"]
    if distribution == "normal":
        return jax.nn.sigmoid(x1), jax.nn.sigmoid(x2)
    return jax.nn.softplus(x1), jax.nn.softplus(x2)


# TODO(synk): select_action's distribution sampling (Beta/Normal sample,
# np.random.choice) is host-side policy logic, not part of the forward pass.

# ---------------------------------------------------------------------------
if __name__ == "__main__":
    key = jax.random.PRNGKey(0)
    k_param, k_x = jax.random.split(key)

    B, NUM_FEATURES, NUM_ACTIONS = 8, 16, 4
    params = init_actor_params(k_param, NUM_FEATURES, NUM_ACTIONS)
    x = jax.random.normal(k_x, (B, NUM_FEATURES), jnp.float32)

    # Discrete actor: softmax policy over actions (f32 path, exact divide).
    probs = actor_forward(params, x, action_type=ACTION_DISCRETE)
    probs = jax.block_until_ready(probs)
    probs_ref = actor_forward_ref(params, x, action_type=ACTION_DISCRETE)
    assert jnp.allclose(probs, probs_ref, atol=1e-4, rtol=1e-4)
    assert jnp.allclose(jnp.sum(probs, axis=-1), 1.0, atol=1e-4)

    # Continuous actor, beta distribution parameters (softplus heads).
    a_beta, b_beta = actor_forward(params, x, action_type=ACTION_CONTINUOUS,
                                   distribution="beta")
    a_beta = jax.block_until_ready(a_beta)
    b_beta = jax.block_until_ready(b_beta)
    a_ref, b_ref = actor_forward_ref(params, x, action_type=ACTION_CONTINUOUS,
                                     distribution="beta")
    assert jnp.allclose(a_beta, a_ref, atol=1e-4, rtol=1e-4)
    assert jnp.allclose(b_beta, b_ref, atol=1e-4, rtol=1e-4)

    # Continuous actor, normal distribution parameters (sigmoid heads).
    m_norm, s_norm = actor_forward(params, x, action_type=ACTION_CONTINUOUS,
                                   distribution="normal")
    m_norm = jax.block_until_ready(m_norm)
    s_norm = jax.block_until_ready(s_norm)
    m_ref, s_ref = actor_forward_ref(params, x, action_type=ACTION_CONTINUOUS,
                                     distribution="normal")
    assert jnp.allclose(m_norm, m_ref, atol=1e-4, rtol=1e-4)
    assert jnp.allclose(s_norm, s_ref, atol=1e-4, rtol=1e-4)

    # bf16 fast path (v6e/v7x-oriented): bf16 x/weights into the MXU and bf16
    # output store, f32 accumulation/element-wise math -> relaxed tolerance.
    probs_bf16 = actor_forward(params, x, action_type=ACTION_DISCRETE,
                               compute_dtype=jnp.bfloat16,
                               out_dtype=jnp.bfloat16)
    probs_bf16 = jax.block_until_ready(probs_bf16)
    assert jnp.allclose(probs_bf16.astype(jnp.float32), probs_ref,
                        atol=3e-2, rtol=3e-2)
    assert jnp.allclose(jnp.sum(probs_bf16.astype(jnp.float32), axis=-1),
                        1.0, atol=2e-2)

    print("KERNEL_OK")
</pallas_src>

<mosaic_0001>
module attributes {stable_mosaic.version = 11 : i64} {
  func.func @_actor_discrete_kernel(%arg0: i32, %arg1: memref<8x16xf32, #tpu.memory_space<vmem>>, %arg2: memref<16x32xf32, #tpu.memory_space<vmem>>, %arg3: memref<1x32xf32, #tpu.memory_space<vmem>>, %arg4: memref<32x32xf32, #tpu.memory_space<vmem>>, %arg5: memref<1x32xf32, #tpu.memory_space<vmem>>, %arg6: memref<32x8xf32, #tpu.memory_space<vmem>>, %arg7: memref<1x8xf32, #tpu.memory_space<vmem>>, %arg8: memref<8x8xf32, #tpu.memory_space<vmem>>) attributes {dimension_semantics = [#tpu.dimension_semantics<parallel>], iteration_bounds = array<i64: 1>, scalar_prefetch = 0 : i64, scratch_operands = 0 : i64, tpu.core_type = #tpu.core_type<tc>, window_params = [{transform_indices = @transform_0, window_bounds = array<i64: 8, 16>}, {pipeline_mode = #tpu.pipeline_mode<synchronous>, transform_indices = @transform_1, window_bounds = array<i64: 16, 32>}, {pipeline_mode = #tpu.pipeline_mode<synchronous>, transform_indices = @transform_2, window_bounds = array<i64: 1, 32>}, {pipeline_mode = #tpu.pipeline_mode<synchronous>, transform_indices = @transform_3, window_bounds = array<i64: 32, 32>}, {pipeline_mode = #tpu.pipeline_mode<synchronous>, transform_indices = @transform_4, window_bounds = array<i64: 1, 32>}, {pipeline_mode = #tpu.pipeline_mode<synchronous>, transform_indices = @transform_5, window_bounds = array<i64: 32, 8>}, {pipeline_mode = #tpu.pipeline_mode<synchronous>, transform_indices = @transform_6, window_bounds = array<i64: 1, 8>}, {transform_indices = @transform_7, window_bounds = array<i64: 8, 8>}]} {
    %c0 = arith.constant 0 : index
    %c0_0 = arith.constant 0 : index
    %0 = vector.load %arg1[%c0, %c0_0] : memref<8x16xf32, #tpu.memory_space<vmem>>, vector<8x16xf32>
    %c0_1 = arith.constant 0 : index
    %c0_2 = arith.constant 0 : index
    %1 = vector.load %arg2[%c0_1, %c0_2] : memref<16x32xf32, #tpu.memory_space<vmem>>, vector<16x32xf32>
    %cst = arith.constant dense<0.000000e+00> : vector<8x32xf32>
    %2 = tpu.matmul %0, %1, %cst {dimension_numbers = #tpu.dot_dimension_numbers<[1], [0], [0], [1], [0, 0, 1, 1], [], []>} : vector<8x16xf32>, vector<16x32xf32>, vector<8x32xf32> -> vector<8x32xf32>
    %c0_3 = arith.constant 0 : index
    %c0_4 = arith.constant 0 : index
    %3 = vector.load %arg3[%c0_3, %c0_4] : memref<1x32xf32, #tpu.memory_space<vmem>>, vector<1x32xf32>
    %4 = vector.broadcast %3 : vector<1x32xf32> to vector<8x32xf32>
    %5 = arith.addf %2, %4 : vector<8x32xf32>
    %6 = math.tanh %5 : vector<8x32xf32>
    %c0_5 = arith.constant 0 : index
    %c0_6 = arith.constant 0 : index
    %7 = vector.load %arg4[%c0_5, %c0_6] : memref<32x32xf32, #tpu.memory_space<vmem>>, vector<32x32xf32>
    %cst_7 = arith.constant dense<0.000000e+00> : vector<8x32xf32>
    %8 = tpu.matmul %6, %7, %cst_7 {dimension_numbers = #tpu.dot_dimension_numbers<[1], [0], [0], [1], [0, 0, 1, 1], [], []>} : vector<8x32xf32>, vector<32x32xf32>, vector<8x32xf32> -> vector<8x32xf32>
    %c0_8 = arith.constant 0 : index
    %c0_9 = arith.constant 0 : index
    %9 = vector.load %arg5[%c0_8, %c0_9] : memref<1x32xf32, #tpu.memory_space<vmem>>, vector<1x32xf32>
    %10 = vector.broadcast %9 : vector<1x32xf32> to vector<8x32xf32>
    %11 = arith.addf %8, %10 : vector<8x32xf32>
    %12 = math.tanh %11 : vector<8x32xf32>
    %c0_10 = arith.constant 0 : index
    %c0_11 = arith.constant 0 : index
    %13 = vector.load %arg6[%c0_10, %c0_11] : memref<32x8xf32, #tpu.memory_space<vmem>>, vector<32x8xf32>
    %cst_12 = arith.constant dense<0.000000e+00> : vector<8x8xf32>
    %14 = tpu.matmul %12, %13, %cst_12 {dimension_numbers = #tpu.dot_dimension_numbers<[1], [0], [0], [1], [0, 0, 1, 1], [], []>} : vector<8x32xf32>, vector<32x8xf32>, vector<8x8xf32> -> vector<8x8xf32>
    %c0_13 = arith.constant 0 : index
    %c0_14 = arith.constant 0 : index
    %15 = vector.load %arg7[%c0_13, %c0_14] : memref<1x8xf32, #tpu.memory_space<vmem>>, vector<1x8xf32>
    %16 = vector.broadcast %15 : vector<1x8xf32> to vector<8x8xf32>
    %17 = arith.addf %14, %16 : vector<8x8xf32>
    %cst_15 = arith.constant dense<0xFF800000> : vector<8xf32>
    %18 = vector.multi_reduction <maximumf>, %17, %cst_15 [1] : vector<8x8xf32> to vector<8xf32>
    %19 = vector.shape_cast %18 : vector<8xf32> to vector<8x1xf32>
    %20 = vector.broadcast %19 : vector<8x1xf32> to vector<8x8xf32>
    %21 = arith.subf %17, %20 : vector<8x8xf32>
    %22 = math.exp %21 : vector<8x8xf32>
    %cst_16 = arith.constant dense<0.000000e+00> : vector<8xf32>
    %23 = vector.multi_reduction <add>, %22, %cst_16 [1] : vector<8x8xf32> to vector<8xf32>
    %24 = vector.shape_cast %23 : vector<8xf32> to vector<8x1xf32>
    %25 = vector.broadcast %24 : vector<8x1xf32> to vector<8x8xf32>
    %26 = arith.divf %22, %25 : vector<8x8xf32>
    %c0_17 = arith.constant 0 : index
    %c0_18 = arith.constant 0 : index
    %27 = vector.load %arg8[%c0_17, %c0_18] : memref<8x8xf32, #tpu.memory_space<vmem>>, vector<8x8xf32>
    tpu.vector_store %arg8[%c0_17, %c0_18], %26 {strides = array<i32>} : memref<8x8xf32, #tpu.memory_space<vmem>>, vector<8x8xf32>,
    return
  }
  func.func @transform_0(%arg0: i32) -> (i32, i32) {
    %c0_i32 = arith.constant 0 : i32
    %c0_i32_0 = arith.constant 0 : i32
    return %arg0, %c0_i32 : i32, i32
  }
  func.func @transform_1(%arg0: i32) -> (i32, i32) {
    %c0_i32 = arith.constant 0 : i32
    %c0_i32_0 = arith.constant 0 : i32
    %c0_i32_1 = arith.constant 0 : i32
    return %c0_i32, %c0_i32_0 : i32, i32
  }
  func.func @transform_2(%arg0: i32) -> (i32, i32) {
    %c0_i32 = arith.constant 0 : i32
    %c0_i32_0 = arith.constant 0 : i32
    %c0_i32_1 = arith.constant 0 : i32
    return %c0_i32, %c0_i32_0 : i32, i32
  }
  func.func @transform_3(%arg0: i32) -> (i32, i32) {
    %c0_i32 = arith.constant 0 : i32
    %c0_i32_0 = arith.constant 0 : i32
    %c0_i32_1 = arith.constant 0 : i32
    return %c0_i32, %c0_i32_0 : i32, i32
  }
  func.func @transform_4(%arg0: i32) -> (i32, i32) {
    %c0_i32 = arith.constant 0 : i32
    %c0_i32_0 = arith.constant 0 : i32
    %c0_i32_1 = arith.constant 0 : i32
    return %c0_i32, %c0_i32_0 : i32, i32
  }
  func.func @transform_5(%arg0: i32) -> (i32, i32) {
    %c0_i32 = arith.constant 0 : i32
    %c0_i32_0 = arith.constant 0 : i32
    %c0_i32_1 = arith.constant 0 : i32
    return %c0_i32, %c0_i32_0 : i32, i32
  }
  func.func @transform_6(%arg0: i32) -> (i32, i32) {
    %c0_i32 = arith.constant 0 : i32
    %c0_i32_0 = arith.constant 0 : i32
    %c0_i32_1 = arith.constant 0 : i32
    return %c0_i32, %c0_i32_0 : i32, i32
  }
  func.func @transform_7(%arg0: i32) -> (i32, i32) {
    %c0_i32 = arith.constant 0 : i32
    %c0_i32_0 = arith.constant 0 : i32
    return %arg0, %c0_i32 : i32, i32
  }
}

</mosaic_0001>

<bundles_post_ra>
// kernel: tpu_custom_call.1
= control target key start
LH: loop header
LB: loop body
LE: loop exit
PB: predicated region body
PF: predicated region fallthrough
CT: control target
= control target key end

     0   :  { %12 = vsyncpa [#allocation3], 0  ;;  %s559_s0 = inlined_call_operand.hbm [shape: f32[8,16], index: 0, kind: input, shape index: {}]   ;;  %s560_s1 = inlined_call_operand.vmem [shape: f32[16,32], index: 1, kind: input, shape index: {}]   ;;  %s561_s2 = inlined_call_operand.vmem [shape: f32[1,32], index: 2, kind: input, shape index: {}]   ;;  %s562_s3 = inlined_call_operand.vmem [shape: f32[32,32], index: 3, kind: input, shape index: {}]   ;;  %s563_s4 = inlined_call_operand.vmem [shape: f32[1,32], index: 4, kind: input, shape index: {}]   ;;  %s564_s5 = inlined_call_operand.vmem [shape: f32[32,8], index: 5, kind: input, shape index: {}]   ;;  %s565_s6 = inlined_call_operand.vmem [shape: f32[1,8], index: 6, kind: input, shape index: {}]   ;;  %s566_s7 = inlined_call_operand.hbm [shape: f32[8,8], index: 7, kind: output, shape index: {}]  }
   0x1   :  { %13 = vsyncpa [#allocation4], 0  ;;  %s446_s24 = smov [#allocation2]   ;;  %s398_s28 = scalar_lea.hbm %s559_s0, 128 }
   0x2   :  { %s20_s25 = sshll.u32 %s446_s24, 4  ;;  %p399_p0 = scmp.ne.s32.totalorder %s559_s0, %s398_s28  ;;  %s21_s25 = int_to_ptr.vmem [resolvable:$true] %s20_s25 }
   0x3   :  { %p402_p1 = scmp.lt.u32.totalorder %s398_s28, %s559_s0 }
   0x5   :  { %p404_p2 = pnand %p402_p1, %p399_p0 }
   0x7   :  { %407 = shalt.err (!%p404_p2)
}
   0x8   :  { %s408_s10 = scalar_lea.vmem %s21_s25, 128  ;;  %p413_p4 = scmp.lt.s32.totalorder %s21_s25, %s21_s25 }
   0x9   :  { %p409_p3 = scmp.ne.s32.totalorder %s21_s25, %s408_s10  ;;  %p414_p5 = scmp.lt.s32.totalorder %s408_s10, %s408_s10 }
   0xb   :  { %p415_p6 = por %p414_p5, %p413_p4 }
   0xd   :  { %p416_p7 = pnand %p415_p6, %p409_p3 }
   0xf   :  { %419 = shalt.err (!%p416_p7)
}
  0x10   :  { %23 = dma.hbm_to_vmem [thread:$0]  %s559_s0, 128, %s21_s25, [#allocation3]  }
  0x11   :  { %442 = dma.done.wait [#allocation3], 128  }
  0x12   :  { %443 = vsyncadd [#allocation3], 4294967168  ;;  %v447_v0 = vmov 0.0|0.0   ;;  %vm448_vm0 = vmmov 0   ;;  %v449_v1 = vmov 0.0   ;;  %v40_v2 = vld [vmem:[%s560_s1] sm:$0xff] }
  0x13   :  { %370 = vmatprep.subr.bf16.mxu0 %v447_v0  ;;  %345 = vmatprep.mubr.msk.f32.mxu0 %vm448_vm0, %v449_v1  ;;  %v41_v3 = vld [vmem:[%s560_s1 + $0x8] sm:$0xff]  ;;  %v39_v5 = vld [vmem:[#allocation2] sm:$0xff]  ;;  %vm49_vm1 = vcmask 130048   ;;  %v126_v8 = vld [vmem:[%s562_s3 + $0x10] sm:$0xff]  ;;  %vm135_vm2 = vcmask 261120   ;;  %vm294_vm3 = vcmask 64512  }
  0x14   :  { %373 = vmatprep.subr.bf16.mxu1 %v447_v0  ;;  %356 = vmatprep.mubr.msk.f32.mxu1 %vm448_vm0, %v449_v1  ;;  %v371_v4 = vpack.c.bf16 %v41_v3, %v40_v2  ;;  %v124_v6 = vld [vmem:[%s562_s3] sm:$0xff]  ;;  %v125_v7 = vld [vmem:[%s562_s3 + $0x8] sm:$0xff]  ;;  %v127_v10 = vld [vmem:[%s562_s3 + $0x18] sm:$0xff] }
  0x15   :  { %v374_v9 = vpack.c.bf16 %v125_v7, %v124_v6  ;;  %v377_v11 = vpack.c.bf16 %v127_v10, %v126_v8  ;;  %v322_v12 = vld [vmem:[%s561_s2] ss:$0 sm:$0xff]  ;;  %v211_v18 = vld [vmem:[%s564_s5 + $0x8] sm:$0xff]  ;;  %v212_v19 = vld [vmem:[%s564_s5 + $0x10] sm:$0xff] }
  0x16   :  { %372 = vmatpush3.bf16.msra.mxu0 %v371_v4  ;;  %v210_v17 = vld [vmem:[%s564_s5] sm:$0xff]  ;;  %v213_v21 = vld [vmem:[%s564_s5 + $0x18] sm:$0xff] }
  0x17   :  { %379 = vmatprep.subr.bf16.mxu0 %v447_v0  ;;  %375 = vmatpush3.bf16.msra.mxu1 %v374_v9  ;;  %v380_v20 = vpack.c.bf16 %v211_v18, %v210_v17  ;;  %v383_v22 = vpack.c.bf16 %v213_v21, %v212_v19  ;;  %v324_v23 = vld [vmem:[%s563_s4] ss:$0 sm:$0xff]  ;;  %s450_s4 = smov [#allocation5]  }
  0x18   :  { %376 = vmatprep.subr.bf16.mxu1 %v447_v0  ;;  %v326_v28 = vld [vmem:[%s565_s6] ss:$0 sm:$0xff]  ;;  %s313_s5 = sshll.u32 %s450_s4, 4  ;;  %s314_s5 = int_to_ptr.vmem [resolvable:$true] %s313_s5 }
  0x19   :  { %346 = vmatmul.mubr.msk.f32.vlgmr.msra.gmra.mrb[0].mxu0 %vm49_vm1, %v39_v5  ;;  %s420_s6 = scalar_lea.vmem %s314_s5, 128  ;;  %p425_p9 = scmp.lt.s32.totalorder %s314_s5, %s314_s5 }
  0x1a   :  { %367 = vmatprep.mubr.msk.f32.mxu0 %vm448_vm0, %v449_v1  ;;  %381 = vmatpush3.bf16.msra.mxu0 %v380_v20  ;;  %p421_p8 = scmp.ne.s32.totalorder %s314_s5, %s420_s6  ;;  %p426_p10 = scmp.lt.s32.totalorder %s420_s6, %s420_s6 }
  0x1b   :  { %378 = vmatpush3.bf16.msra.mxu1 %v377_v11  ;;  %382 = vmatprep.subr.bf16.mxu0 %v447_v0 }
  0x1c   :  { %p427_p11 = por %p426_p10, %p425_p9 }
  0x1e   :  { %384 = vmatpush3.bf16.msra.mxu0 %v383_v22  ;;  %p428_p12 = pnand %p427_p11, %p421_p8 }
  0xec   :  { %v119_v13 = vpop.f32.mrb[0].mxu0 }
  0xed   :  { %v120_v14 = vadd.f32 %v322_v12, %v119_v13  ;;  %v347_v15 = vpop.f32.mrb[1].mxu0 }
  0xef   :  { %390 = vtanh.f32 %v120_v14 }
  0xf9   :  { %v391_v16 = vpop.eup %390 }
  0xfa   :  { %357 = vmatmul.mubr.msk.f32.vlgmr.msra.gmra.mrb[0].mxu1 %vm135_vm2, %v391_v16 }
 0x1cd   :  { %v205_v24 = vpop.f32.mrb[0].mxu1 }
 0x1ce   :  { %v206_v25 = vadd.f32 %v324_v23, %v205_v24  ;;  %v358_v26 = vpop.f32.mrb[1].mxu1 }
 0x1d0   :  { %392 = vtanh.f32 %v206_v25 }
 0x1da   :  { %v393_v27 = vpop.eup %392 }
 0x1db   :  { %368 = vmatmul.mubr.msk.f32.vlgmr.msra.gmra.mrb[2].mxu0 %vm135_vm2, %v393_v27 }
 0x2ae   :  { %v290_v29 = vpop.f32.mrb[2].mxu0 }
 0x2af   :  { %v291_v30 = vadd.f32 %v326_v28, %v290_v29  ;;  %v369_v31 = vpop.f32.mrb[3].mxu0 }
 0x2b1   :  { %v295_v32 = vsel %vm294_vm3, %v291_v30, -inf }
 0x2b2   :  { %296 = vmax.xlane.f32.xlu0 %v295_v32 }
 0x33f   :  { %v297_v33 = vpop.xlane.xlu0 %296 }
 0x340   :  { %v298_v34 = vsub.f32 %v291_v30, %v297_v33 }
 0x342   :  { %v299_v35 = vmul.f32 1.442695, %v298_v34 }
 0x344   :  { %394 = vpow2.f32 %v299_v35 }
 0x34e   :  { %v395_v36 = vpop.eup %394 }
 0x34f   :  { %v301_v37 = vsel %vm294_vm3, %v395_v36, 0.0 }
 0x350   :  { %302 = vadd.xlane.f32.xlu0 %v301_v37 }
 0x3dd   :  { %v303_v38 = vpop.xlane.xlu0 %302 }
 0x3de   :  { %396 = vrcp.f32 %v303_v38 }
 0x3e8   :  { %v397_v39 = vpop.eup %396 }
 0x3e9   :  { %v305_v40 = vmul.f32 %v397_v39, %v395_v36 }
 0x3eb   :  { %306 = vst.msk [vmem:[#allocation5] sm:$0xff] %vm294_vm3, %v305_v40 }
 0x3ec   :  { %431 = shalt.err (!%p428_p12)
}
 0x3ed   :  { %s432_s14 = scalar_lea.hbm %s566_s7, 128 }
 0x3ee   :  { %p433_p13 = scmp.ne.s32.totalorder %s566_s7, %s432_s14  ;;  %p436_p0 = scmp.lt.u32.totalorder %s432_s14, %s566_s7 }
 0x3f0   :  { %p438_p1 = pnand %p436_p0, %p433_p13 }
 0x3f2   :  { %441 = shalt.err (!%p438_p1)
}
 0x3f3   :  { %316 = dma.vmem_to_hbm [thread:$0]  %s314_s5, 128, %s566_s7, [#allocation4]  }
 0x3f4   :  { %444 = dma.done.wait [#allocation4], 128  }
 0x3f5   :  { %445 = vsyncadd [#allocation4], 4294967168 }
 0x3f6   :  { %320 = vsyncpa [#allocation3], 1 }
 0x3f7   :  { %321 = vsyncpa [#allocation4], 1 }

</bundles_post_ra>
